<compile_context>
chip_gen: v7x
topology: tpu7x:2x2x1
jax: 0.10.0
libtpu: 0.0.40
codegen_flags: <defaults>
</compile_context>

<pallas_src>
import jax
import jax.numpy as jnp
from jax import lax
from jax.experimental import pallas as pl
from jax.experimental.pallas import tpu as pltpu

N_DIGITS = 10
EVENT = 1 * 28 * 28   # 784


def _cond_bernoulli_kernel(idx_ref, logits_ref, probs_ref):
    # idx_ref:    (TB, 1)   int32 digit indices for this batch tile (VMEM)
    # logits_ref: (10, 784) full logits table, resident in VMEM
    # probs_ref:  (TB, 784) output probabilities
    table = logits_ref[...]
    # sigmoid(x) = 0.5*tanh(0.5*x) + 0.5  -> one EUP transcendental per elem,
    # applied to the small table (10*784) instead of the full (TB*784) block.
    probs_table = 0.5 * jnp.tanh(0.5 * table) + 0.5            # (10, 784)

    tb = idx_ref.shape[0]
    ids = jnp.clip(idx_ref[...], 0, N_DIGITS - 1)              # (TB, 1)
    onehot = (ids == lax.broadcasted_iota(jnp.int32, (tb, N_DIGITS), 1)
              ).astype(jnp.float32)                            # (TB, 10)
    # Exact row gather on the MXU (one-hot rows are exactly 0.0 / 1.0).
    probs_ref[...] = jnp.dot(onehot, probs_table,
                             preferred_element_type=jnp.float32)


def conditional_digit_distribution(x, logits, *, tb=512):
    """x: (B,) int digit indices in [0,10); logits: (10, 784) f32.
    Returns probs: (B, 1, 28, 28) f32 == sigmoid(logits[x]).reshape(...)."""
    B = x.shape[0]
    n_rows, ev = logits.shape
    assert (n_rows, ev) == (N_DIGITS, EVENT)

    # Round batch up to a multiple of 8 (sublane-dense), pick TB, pad indices.
    b8 = ((B + 7) // 8) * 8
    TB = min(tb, b8)
    B_pad = ((b8 + TB - 1) // TB) * TB
    x32 = x.astype(jnp.int32).reshape(B, 1)
    if B_pad == B:
        x_p = x32                               # no padding copy needed
    else:
        x_p = jnp.zeros((B_pad, 1), jnp.int32).at[:B].set(x32)

    probs = pl.pallas_call(
        _cond_bernoulli_kernel,
        out_shape=jax.ShapeDtypeStruct((B_pad, EVENT), jnp.float32),
        grid_spec=pltpu.PrefetchScalarGridSpec(
            num_scalar_prefetch=0,
            grid=(B_pad // TB,),
            in_specs=[
                # per-tile indices
                pl.BlockSpec((TB, 1), lambda i: (i, 0)),
                # whole logits table, constant block index -> resident in VMEM
                pl.BlockSpec((N_DIGITS, EVENT), lambda i: (0, 0)),
            ],
            out_specs=pl.BlockSpec((TB, EVENT), lambda i: (i, 0)),
        ),
        compiler_params=pltpu.CompilerParams(
            dimension_semantics=("parallel",)),
    )(x_p, logits.astype(jnp.float32))

    # glue: drop batch padding (no-op when B_pad == B) and restore the
    # [1, 28, 28] event shape (contiguous reshape, free).
    return probs[:B].reshape(B, 1, 28, 28)


if __name__ == "__main__":
    key = jax.random.PRNGKey(0)
    k_logits, k_x = jax.random.split(key)

    # Deterministic synthetic parameters. (The module's __init__ uses zeros;
    # small random values exercise the gather/sigmoid path.)
    logits = 0.05 * jax.random.normal(k_logits, (N_DIGITS, EVENT),
                                      dtype=jnp.float32)

    # Batch of digit indices (the module's forward input `x`).
    B = 8
    x = jax.random.randint(k_x, (B,), 0, N_DIGITS, dtype=jnp.int32)

    probs = conditional_digit_distribution(x, logits)
    probs = jax.block_until_ready(probs)

    # Reference: sigmoid(logits[x]) reshaped to [B, 1, 28, 28]
    ref = jax.nn.sigmoid(logits[x]).reshape(B, 1, 28, 28)
    assert probs.shape == (B, 1, 28, 28)
    assert jnp.allclose(probs, ref, atol=1e-5, rtol=1e-5)

    # Extra check: batch not a multiple of 8 exercises the padding/slice path.
    B2 = 13
    x2 = jax.random.randint(jax.random.PRNGKey(1), (B2,), 0, N_DIGITS,
                            dtype=jnp.int32)
    probs2 = jax.block_until_ready(conditional_digit_distribution(x2, logits))
    ref2 = jax.nn.sigmoid(logits[x2]).reshape(B2, 1, 28, 28)
    assert probs2.shape == (B2, 1, 28, 28)
    assert jnp.allclose(probs2, ref2, atol=1e-5, rtol=1e-5)

    # TODO(synk): PyTorch returns a torch.distributions object (sample/log_prob);
    # the kernel returns the distribution's probs tensor, which fully
    # parameterizes the IndependentBernoulli.
    print("KERNEL_OK")
</pallas_src>

<mosaic_0001>
module attributes {stable_mosaic.version = 11 : i64} {
  func.func @_cond_bernoulli_kernel(%arg0: i32, %arg1: memref<8x1xi32, #tpu.memory_space<vmem>>, %arg2: memref<10x784xf32, #tpu.memory_space<vmem>>, %arg3: memref<8x784xf32, #tpu.memory_space<vmem>>) attributes {dimension_semantics = [#tpu.dimension_semantics<parallel>], iteration_bounds = array<i64: 1>, scalar_prefetch = 0 : i64, scratch_operands = 0 : i64, tpu.core_type = #tpu.core_type<tc>, window_params = [{transform_indices = @transform_0, window_bounds = array<i64: 8, 1>}, {pipeline_mode = #tpu.pipeline_mode<synchronous>, transform_indices = @transform_1, window_bounds = array<i64: 10, 784>}, {transform_indices = @transform_2, window_bounds = array<i64: 8, 784>}]} {
    %c0 = arith.constant 0 : index
    %c0_0 = arith.constant 0 : index
    %0 = vector.load %arg2[%c0, %c0_0] : memref<10x784xf32, #tpu.memory_space<vmem>>, vector<10x784xf32>
    %cst = arith.constant 5.000000e-01 : f32
    %1 = vector.broadcast %cst : f32 to vector<10x784xf32>
    %2 = arith.mulf %1, %0 : vector<10x784xf32>
    %3 = math.tanh %2 : vector<10x784xf32>
    %cst_1 = arith.constant 5.000000e-01 : f32
    %4 = vector.broadcast %cst_1 : f32 to vector<10x784xf32>
    %5 = arith.mulf %4, %3 : vector<10x784xf32>
    %cst_2 = arith.constant 5.000000e-01 : f32
    %6 = vector.broadcast %cst_2 : f32 to vector<10x784xf32>
    %7 = arith.addf %5, %6 : vector<10x784xf32>
    %c0_3 = arith.constant 0 : index
    %c0_4 = arith.constant 0 : index
    %8 = vector.load %arg1[%c0_3, %c0_4] : memref<8x1xi32, #tpu.memory_space<vmem>>, vector<8x1xi32>
    %c0_i32 = arith.constant 0 : i32
    %c9_i32 = arith.constant 9 : i32
    %9 = vector.broadcast %c0_i32 : i32 to vector<8x1xi32>
    %10 = arith.maxsi %9, %8 : vector<8x1xi32>
    %11 = vector.broadcast %c9_i32 : i32 to vector<8x1xi32>
    %12 = arith.minsi %11, %10 : vector<8x1xi32>
    %13 = tpu.iota {dimensions = array<i32: 1>} : vector<8x10xi32>
    %14 = vector.broadcast %12 : vector<8x1xi32> to vector<8x10xi32>
    %15 = arith.cmpi eq, %14, %13 : vector<8x10xi32>
    %16 = arith.extui %15 : vector<8x10xi1> to vector<8x10xi32>
    %17 = arith.sitofp %16 : vector<8x10xi32> to vector<8x10xf32>
    %cst_5 = arith.constant dense<0.000000e+00> : vector<8x784xf32>
    %18 = tpu.matmul %17, %7, %cst_5 {dimension_numbers = #tpu.dot_dimension_numbers<[1], [0], [0], [1], [0, 0, 1, 1], [], []>} : vector<8x10xf32>, vector<10x784xf32>, vector<8x784xf32> -> vector<8x784xf32>
    %c0_6 = arith.constant 0 : index
    %c0_7 = arith.constant 0 : index
    %19 = vector.load %arg3[%c0_6, %c0_7] : memref<8x784xf32, #tpu.memory_space<vmem>>, vector<8x784xf32>
    tpu.vector_store %arg3[%c0_6, %c0_7], %18 {strides = array<i32>} : memref<8x784xf32, #tpu.memory_space<vmem>>, vector<8x784xf32>,
    return
  }
  func.func @transform_0(%arg0: i32) -> (i32, i32) {
    %c0_i32 = arith.constant 0 : i32
    %c0_i32_0 = arith.constant 0 : i32
    return %arg0, %c0_i32 : i32, i32
  }
  func.func @transform_1(%arg0: i32) -> (i32, i32) {
    %c0_i32 = arith.constant 0 : i32
    %c0_i32_0 = arith.constant 0 : i32
    %c0_i32_1 = arith.constant 0 : i32
    return %c0_i32, %c0_i32_0 : i32, i32
  }
  func.func @transform_2(%arg0: i32) -> (i32, i32) {
    %c0_i32 = arith.constant 0 : i32
    %c0_i32_0 = arith.constant 0 : i32
    return %arg0, %c0_i32 : i32, i32
  }
}

</mosaic_0001>

<bundles_post_ra>
// kernel: tpu_custom_call.1
= control target key start
LH: loop header
LB: loop body
LE: loop exit
PB: predicated region body
PF: predicated region fallthrough
CT: control target
= control target key end

     0   :  { %7 = vsyncpa [#allocation3], 0  ;;  %s645_s0 = inlined_call_operand.vmem [shape: s32[8,1], index: 0, kind: input, shape index: {}]   ;;  %s646_s1 = inlined_call_operand.hbm [shape: f32[10,784], index: 1, kind: input, shape index: {}]   ;;  %s647_s2 = inlined_call_operand.hbm [shape: f32[8,784], index: 2, kind: output, shape index: {}]  }
   0x1   :  { %8 = vsyncpa [#allocation4], 0  ;;  %s571_s9 = smov [#allocation2]   ;;  %s523_s13 = scalar_lea.hbm %s646_s1, 1792 }
   0x2   :  { %s16_s10 = sshll.u32 %s571_s9, 4  ;;  %p524_p0 = scmp.ne.s32.totalorder %s646_s1, %s523_s13  ;;  %s17_s10 = int_to_ptr.vmem [resolvable:$true] %s16_s10 }
   0x3   :  { %p527_p1 = scmp.lt.u32.totalorder %s523_s13, %s646_s1 }
   0x5   :  { %p529_p2 = pnand %p527_p1, %p524_p0 }
   0x7   :  { %532 = shalt.err (!%p529_p2)
}
   0x8   :  { %s533_s18 = scalar_lea.vmem %s17_s10, 1792  ;;  %p538_p4 = scmp.lt.s32.totalorder %s17_s10, %s17_s10 }
   0x9   :  { %p534_p3 = scmp.ne.s32.totalorder %s17_s10, %s533_s18  ;;  %p539_p5 = scmp.lt.s32.totalorder %s533_s18, %s533_s18 }
   0xb   :  { %p540_p6 = por %p539_p5, %p538_p4 }
   0xd   :  { %p541_p7 = pnand %p540_p6, %p534_p3 }
   0xf   :  { %544 = shalt.err (!%p541_p7)
}
  0x10   :  { %s572_s19 = smov 896   ;;  %s573_s20 = smov 56  }
  0x11   :  { %22 = dma.hbm_to_vmem [thread:$0]  %s646_s1, 1792, %s17_s10, [#allocation3], %s572_s19, %s572_s19, %s573_s20  }
  0x12   :  { %567 = dma.done.wait [#allocation3], 1792  }
  0x13   :  { %568 = vsyncadd [#allocation3], 4294965504  ;;  %v574_v0 = vmov 0   ;;  %v575_v1 = vmov 0.0   ;;  %v96_v2 = vld [vmem:[%s645_s0] sm:$0xff]  ;;  %v27_v3 = vld [vmem:[#allocation2 + $0x8] sm:$0xff] }
  0x14   :  { %494 = vset.pattern.permute.xlu0 %v574_v0  ;;  %199 = vmatprep.mubr.f32.mxu0 %v575_v1  ;;  %v34_v4 = vld [vmem:[#allocation2 + $0x40] sm:$0x3]  ;;  %vm97_vm0 = vcmp.gt.s32.totalorder %v96_v2, 0  ;;  %v41_v5 = vmul.f32 0.5, %v27_v3  ;;  %v33_v8 = vld [vmem:[#allocation2 + $0x38] sm:$0x3] }
  0x15   :  { %270 = vmatprep.mubr.f32.mxu1 %v575_v1  ;;  %v48_v6 = vmul.f32 0.5, %v34_v4  ;;  %v26_v7 = vld [vmem:[#allocation2] sm:$0xff]  ;;  %v98_v9 = vsel %vm97_vm0, %v96_v2, 0  ;;  %v47_v11 = vmul.f32 0.5, %v33_v8  ;;  %v29_v12 = vld [vmem:[#allocation2 + $0x18] sm:$0xff]  ;;  %v28_v15 = vld [vmem:[#allocation2 + $0x10] sm:$0xff] }
  0x16   :  { %v40_v10 = vmul.f32 0.5, %v26_v7  ;;  %v36_v13 = vld [vmem:[#allocation2 + $0x50] sm:$0x3]  ;;  %vm99_vm1 = vcmp.lt.s32.totalorder %v98_v9, 9  ;;  %495 = vtanh.f32 %v41_v5  ;;  %v43_v14 = vmul.f32 0.5, %v29_v12  ;;  %v31_v19 = vld [vmem:[#allocation2 + $0x28] sm:$0xff] }
  0x17   :  { %v35_v16 = vld [vmem:[#allocation2 + $0x48] sm:$0x3]  ;;  %v100_v17 = vsel %vm99_vm1, %v98_v9, 9  ;;  %497 = vtanh.f32 %v48_v6  ;;  %v50_v18 = vmul.f32 0.5, %v36_v13  ;;  %v42_v20 = vmul.f32 0.5, %v28_v15  ;;  %v30_v62 = vld [vmem:[#allocation2 + $0x20] sm:$0xff] }
  0x18   :  { %104 = vperm.xlu0 %494, %v100_v17   ;;  %499 = vtanh.f32 %v40_v10  ;;  %v38_v21 = vld [vmem:[#allocation2 + $0x60] sm:$0x3]  ;;  %v49_v22 = vmul.f32 0.5, %v35_v16  ;;  %v45_v23 = vmul.f32 0.5, %v31_v19  ;;  %vm113_vm2 = vcmask 1041408   ;;  %v32_v0 = vld [vmem:[#allocation2 + $0x30] sm:$0xff] }
  0x19   :  { %501 = vtanh.f32 %v47_v11  ;;  %v52_v24 = vmul.f32 0.5, %v38_v21  ;;  %vm576_vm3 = vmmov 1   ;;  %v577_v61 = vmov 0.0|0.0   ;;  %v37_v63 = vld [vmem:[#allocation2 + $0x58] sm:$0x3]  ;;  %s579_s0 = smov [#allocation5]  }
  0x1a   :  { %503 = vtanh.f32 %v43_v14  ;;  %vm612_vm4 = vmpackc.low %vm113_vm2, %vm576_vm3  ;;  %v44_v2 = vmul.f32 0.5, %v30_v62  ;;  %v39_v3 = vld [vmem:[#allocation2 + $0x68] sm:$0x3]  ;;  %v51_v4 = vmul.f32 0.5, %v37_v63  ;;  %v46_v5 = vmul.f32 0.5, %v32_v0  ;;  %s432_s1 = sshll.u32 %s579_s0, 4  ;;  %s433_s1 = int_to_ptr.vmem [resolvable:$true] %s432_s1 }
  0x1b   :  { %505 = vtanh.f32 %v50_v18  ;;  %v53_v6 = vmul.f32 0.5, %v39_v3  ;;  %v101_v15 = vlaneseq  ;;  %vm109_vm5 = vcmask 80896   ;;  %s545_s25 = scalar_lea.vmem %s433_s1, 896  ;;  %p550_p9 = scmp.lt.s32.totalorder %s433_s1, %s433_s1 }
  0x1c   :  { %507 = vtanh.f32 %v42_v20  ;;  %vm578_vm7 = vmmov 0   ;;  %vm424_vm8 = vcmask 130048   ;;  %p546_p8 = scmp.ne.s32.totalorder %s433_s1, %s545_s25  ;;  %p551_p10 = scmp.lt.s32.totalorder %s545_s25, %s545_s25 }
  0x1d   :  { %509 = vtanh.f32 %v49_v22  ;;  %v102_v20 = vand.u32 127, %v101_v15 }
  0x1e   :  { %511 = vtanh.f32 %v45_v23  ;;  %p552_p11 = por %p551_p10, %p550_p9 }
  0x1f   :  { %513 = vtanh.f32 %v52_v24 }
  0x20   :  { %v496_v25 = vpop.eup %495  ;;  %515 = vtanh.f32 %v44_v2  ;;  %p553_p12 = pnand %p552_p11, %p546_p8 }
  0x21   :  { %v498_v26 = vpop.eup %497  ;;  %v69_v27 = vmul.f32 0.5, %v496_v25  ;;  %517 = vtanh.f32 %v51_v4 }
  0x22   :  { %v500_v28 = vpop.eup %499  ;;  %v76_v29 = vmul.f32 0.5, %v498_v26  ;;  %519 = vtanh.f32 %v46_v5 }
  0x23   :  { %v502_v30 = vpop.eup %501  ;;  %v83_v31 = vadd.f32 0.5, %v69_v27  ;;  %v68_v32 = vmul.f32 0.5, %v500_v28  ;;  %521 = vtanh.f32 %v53_v6 }
  0x24   :  { %v504_v33 = vpop.eup %503  ;;  %v90_v34 = vadd.f32 0.5, %v76_v29  ;;  %v75_v35 = vmul.f32 0.5, %v502_v30 }
  0x25   :  { %v506_v36 = vpop.eup %505  ;;  %v82_v38 = vadd.f32 0.5, %v68_v32  ;;  %v71_v39 = vmul.f32 0.5, %v504_v33 }
  0x26   :  { %v508_v40 = vpop.eup %507  ;;  %v463_v41 = vpack.c.bf16 %v90_v34, %v83_v31  ;;  %v89_v42 = vadd.f32 0.5, %v75_v35  ;;  %v78_v43 = vmul.f32 0.5, %v506_v36 }
  0x27   :  { %v510_v44 = vpop.eup %509  ;;  %v85_v45 = vadd.f32 0.5, %v71_v39  ;;  %v70_v46 = vmul.f32 0.5, %v508_v40 }
  0x28   :  { %v512_v47 = vpop.eup %511  ;;  %465 = vmatprep.subr.msk.bf16.mxu0 %vm612_vm4, %v463_v41  ;;  %v466_v48 = vpack.c.bf16 %v89_v42, %v82_v38  ;;  %v92_v49 = vadd.f32 0.5, %v78_v43  ;;  %v77_v50 = vmul.f32 0.5, %v510_v44 }
  0x29   :  { %v514_v51 = vpop.eup %513  ;;  %v84_v52 = vadd.f32 0.5, %v70_v46  ;;  %v73_v53 = vmul.f32 0.5, %v512_v47 }
  0x2a   :  { %468 = vmatpush1.bf16.msk.msra.mxu0 %vm612_vm4, %v466_v48  ;;  %v469_v54 = vpack.c.bf16 %v92_v49, %v85_v45  ;;  %v91_v55 = vadd.f32 0.5, %v77_v50  ;;  %v80_v56 = vmul.f32 0.5, %v514_v51  ;;  %v516_v7 = vpop.eup %515 }
  0x2b   :  { %v87_v57 = vadd.f32 0.5, %v73_v53  ;;  %v518_v8 = vpop.eup %517  ;;  %v72_v11 = vmul.f32 0.5, %v516_v7 }
  0x2c   :  { %471 = vmatprep.subr.msk.bf16.mxu1 %vm612_vm4, %v469_v54  ;;  %v472_v58 = vpack.c.bf16 %v91_v55, %v84_v52  ;;  %v94_v59 = vadd.f32 0.5, %v80_v56  ;;  %v520_v9 = vpop.eup %519  ;;  %v79_v12 = vmul.f32 0.5, %v518_v8 }
  0x2d   :  { %v522_v10 = vpop.eup %521  ;;  %v74_v13 = vmul.f32 0.5, %v520_v9  ;;  %v86_v16 = vadd.f32 0.5, %v72_v11 }
  0x2e   :  { %474 = vmatpush1.bf16.msk.msra.mxu1 %vm612_vm4, %v472_v58  ;;  %v475_v60 = vpack.c.bf16 %v94_v59, %v87_v57  ;;  %v81_v14 = vmul.f32 0.5, %v522_v10  ;;  %v93_v17 = vadd.f32 0.5, %v79_v12 }
  0x2f   :  { %481 = vmatprep.subr.bf16.mxu1 %v577_v61  ;;  %v88_v18 = vadd.f32 0.5, %v74_v13 }
  0x30   :  { %477 = vmatprep.subr.msk.bf16.mxu0 %vm612_vm4, %v475_v60  ;;  %v95_v19 = vadd.f32 0.5, %v81_v14  ;;  %v478_v22 = vpack.c.bf16 %v93_v17, %v86_v16 }
  0x32   :  { %v482_v23 = vpack.c.bf16 %v95_v19, %v88_v18 }
  0x97   :  { %v105_v21 = vpop.permute.xlu0 %104 }
  0x98   :  { %vm106_vm6 = vcmp.eq.s32.totalorder %v105_v21, %v102_v20 }
  0x99   :  { %v441_v24 = vsel %vm106_vm6, 1.0, %v575_v1 }
  0x9a   :  { %444 = vmatmul.mubr.msk.f32.vlgmr.msra.gmra.mrb[0].mxu0 %vm109_vm5, %v441_v24  ;;  %447 = vmatmul.mubr.msk.f32.vlgmr.msra.gmra.mrb[0].mxu1 %vm109_vm5, %v441_v24 }
  0x9b   :  { %480 = vmatpush1.bf16.msk.msra.mxu0 %vm612_vm4, %v478_v22  ;;  %484 = vmatpush3.bf16.msk.msra.mxu1 %vm612_vm4, %v482_v23 }
  0x9c   :  { %341 = vmatprep.mubr.f32.mxu0 %v575_v1  ;;  %460 = vmatprep.mubr.msk.f32.mxu1 %vm578_vm7, %v575_v1 }
  0x9e   :  { %450 = vmatmul.mubr.msk.f32.vlgmr.msra.gmra.mrb[2].mxu0 %vm109_vm5, %v441_v24  ;;  %461 = vmatmul.mubr.msk.f32.vlgmr.msra.gmra.mrb[2].mxu1 %vm109_vm5, %v441_v24 }
 0x16d   :  { %v201_v25 = vpop.f32.mrb[0].mxu0  ;;  %v272_v26 = vpop.f32.mrb[0].mxu1 }
 0x16e   :  { %418 = vst [vmem:[#allocation5] sm:$0xff] %v201_v25  ;;  %420 = vst [vmem:[#allocation5 + $0x10] sm:$0xff] %v272_v26  ;;  %v203_v27 = vpop.f32.mrb[1].mxu0  ;;  %v274_v28 = vpop.f32.mrb[1].mxu1 }
 0x16f   :  { %419 = vst [vmem:[#allocation5 + $0x8] sm:$0xff] %v203_v27  ;;  %421 = vst [vmem:[#allocation5 + $0x18] sm:$0xff] %v274_v28 }
 0x171   :  { %v343_v29 = vpop.f32.mrb[2].mxu0  ;;  %v414_v30 = vpop.f32.mrb[2].mxu1 }
 0x172   :  { %422 = vst [vmem:[#allocation5 + $0x20] sm:$0xff] %v343_v29  ;;  %425 = vst.msk [vmem:[#allocation5 + $0x30] sm:$0xff] %vm424_vm8, %v414_v30  ;;  %v345_v31 = vpop.f32.mrb[3].mxu0  ;;  %v462_v1 = vpop.f32.mrb[3].mxu1 }
 0x173   :  { %423 = vst [vmem:[#allocation5 + $0x28] sm:$0xff] %v345_v31 }
 0x174   :  { %556 = shalt.err (!%p553_p12)
}
 0x175   :  { %s557_s28 = scalar_lea.hbm %s647_s2, 896 }
 0x176   :  { %p558_p13 = scmp.ne.s32.totalorder %s647_s2, %s557_s28  ;;  %p561_p0 = scmp.lt.u32.totalorder %s557_s28, %s647_s2 }
 0x178   :  { %p563_p1 = pnand %p561_p0, %p558_p13 }
 0x17a   :  { %566 = shalt.err (!%p563_p1)
}
 0x17b   :  { %435 = dma.vmem_to_hbm [thread:$0]  %s433_s1, 896, %s647_s2, [#allocation4]  }
 0x17c   :  { %569 = dma.done.wait [#allocation4], 896  }
 0x17d   :  { %570 = vsyncadd [#allocation4], 4294966400 }
 0x17e   :  { %439 = vsyncpa [#allocation3], 1 }
 0x17f   :  { %440 = vsyncpa [#allocation4], 1 }

</bundles_post_ra>
